<compile_context>
chip_gen: v6e
topology: v6e:2x2x1
jax: 0.10.0
libtpu: 0.0.40
codegen_flags: <defaults>
</compile_context>

<pallas_src>
from math import sqrt

import jax
import jax.numpy as jnp
from jax.experimental import pallas as pl
from jax.experimental.pallas import tpu as pltpu


def _round_up(x: int, m: int) -> int:
    return ((x + m - 1) // m) * m


def _make_mlp_kernel(num_layers: int):
    """Fused MLP forward: all (padded, square) matmuls + activations in-kernel."""

    def kernel(x_ref, w_ref, b_ref, out_ref):
        # x_ref:   [tile, P]      padded activations (P = 128-padded width)
        # w_ref:   [L, P, P]      all layer weights, zero-padded
        # b_ref:   [L, P]         all layer biases, zero-padded
        # out_ref: [tile, P]      lane-dense padded output
        h = x_ref[...]  # f32
        for layer in range(num_layers):
            w = w_ref[layer]                        # [P, P], static index
            b = b_ref[layer:layer + 1, :]           # [1, P], static slice
            h = jnp.dot(h, w, preferred_element_type=jnp.float32) + b
            if layer < num_layers - 1:
                h = jnp.maximum(h, 0.0)             # activation='relu'
            else:
                h = jax.nn.sigmoid(h)               # output_activation='sigmoid'
        out_ref[...] = h.astype(out_ref.dtype)

    return kernel


def cv_mlp_forward(x, weights, biases, *, batch_tile=1024):
    """Run the fused MLP Pallas kernel.

    x:        [batch, num_features] float32
    weights:  list of [in_dim, out_dim] float32
    biases:   list of [1, out_dim] float32 (or [out_dim])
    batch_tile: rows per grid step (tuning knob; clamped to the padded batch).
    """
    num_layers = len(weights)
    batch, num_features = x.shape
    num_targets = weights[-1].shape[-1]

    # ---- lane-dense padding: one common width P covers every layer dim ----
    dims = [num_features] + [w.shape[-1] for w in weights]
    P = _round_up(max(dims), 128)

    # ---- batch tiling (ragged batches handled by zero-padding rows) ----
    tile = min(int(batch_tile), _round_up(batch, 8))
    tile = _round_up(tile, 8)
    batch_pad = _round_up(batch, tile)
    grid = (batch_pad // tile,)

    # ---- pack inputs / params into padded, consolidated tensors ----
    x_pad = jnp.zeros((batch_pad, P), jnp.float32).at[:batch, :num_features].set(
        x.astype(jnp.float32))

    w_packed = jnp.zeros((num_layers, P, P), jnp.float32)
    b_packed = jnp.zeros((num_layers, P), jnp.float32)
    for layer, (w, b) in enumerate(zip(weights, biases)):
        in_d, out_d = w.shape
        w_packed = w_packed.at[layer, :in_d, :out_d].set(w.astype(jnp.float32))
        b_flat = jnp.reshape(b, (-1,)).astype(jnp.float32)
        b_packed = b_packed.at[layer, :out_d].set(b_flat)

    kernel = _make_mlp_kernel(num_layers)

    in_specs = [
        pl.BlockSpec((tile, P), lambda i: (i, 0)),              # x (tiled)
        pl.BlockSpec((num_layers, P, P), lambda i: (0, 0, 0)),  # weights (grid-invariant)
        pl.BlockSpec((num_layers, P), lambda i: (0, 0)),        # biases  (grid-invariant)
    ]
    out_spec = pl.BlockSpec((tile, P), lambda i: (i, 0))        # lane-dense output

    # ---- explicit VMEM budget (keeps big tiles safe on v7x's 64 MiB) ----
    param_bytes = (w_packed.size + _round_up(num_layers, 8) * P) * 4
    io_bytes = 2 * (tile * P * 4) * 2          # x + out, double-buffered
    act_bytes = 6 * tile * P * 4               # live activations / headroom
    vmem_est = io_bytes + 2 * param_bytes + act_bytes
    vmem_limit = int(min(max(2 * vmem_est, 32 * 1024 * 1024), 48 * 1024 * 1024))

    out_pad = pl.pallas_call(
        kernel,
        out_shape=jax.ShapeDtypeStruct((batch_pad, P), jnp.float32),
        grid_spec=pltpu.PrefetchScalarGridSpec(
            num_scalar_prefetch=0,
            grid=grid,
            in_specs=in_specs,
            out_specs=out_spec,
        ),
        compiler_params=pltpu.CompilerParams(
            dimension_semantics=("parallel",),   # shards batch across TCs on v7x
            vmem_limit_bytes=vmem_limit,
        ),
    )(x_pad, w_packed, b_packed)

    # Strip batch / lane padding before returning.
    return out_pad[:batch, :num_targets]


def init_cv_mlp_params(key, num_features, num_targets, num_layers,
                       intermediate_size=32):
    """Uniform(-1/sqrt(fan_in), 1/sqrt(fan_in)) init (torch.nn.Linear default)."""
    dims = [num_features] + [intermediate_size] * (num_layers - 1) + [num_targets]
    weights, biases = [], []
    for layer in range(num_layers):
        fan_in, fan_out = dims[layer], dims[layer + 1]
        key, kw, kb = jax.random.split(key, 3)
        bound = 1.0 / sqrt(fan_in)
        w = jax.random.uniform(kw, (fan_in, fan_out), jnp.float32,
                               minval=-bound, maxval=bound)
        b = jax.random.uniform(kb, (1, fan_out), jnp.float32,
                               minval=-bound, maxval=bound)
        weights.append(w)
        biases.append(b)
    return weights, biases


def _reference_forward(x, weights, biases):
    h = x
    for layer, (w, b) in enumerate(zip(weights, biases)):
        h = h @ w + jnp.reshape(b, (1, -1))
        if layer < len(weights) - 1:
            h = jnp.maximum(h, 0.0)
        else:
            h = jax.nn.sigmoid(h)
    return h


if __name__ == "__main__":
    # Small, forward-consistent shapes.
    batch = 16
    num_features = 32
    num_targets = 4
    num_layers = 3
    intermediate_size = 32

    key = jax.random.PRNGKey(0)
    key, kx = jax.random.split(key)
    x = jax.random.normal(kx, (batch, num_features), jnp.float32)

    weights, biases = init_cv_mlp_params(
        key, num_features, num_targets, num_layers, intermediate_size
    )

    out = cv_mlp_forward(x, weights, biases, batch_tile=1024)
    out = jax.block_until_ready(out)

    ref = _reference_forward(x, weights, biases)
    assert out.shape == (batch, num_targets)
    assert jnp.allclose(out, ref, atol=1e-5, rtol=1e-5), "mismatch vs reference"

    # Also exercise a multi-step grid (ragged batch, tile < batch) for coverage.
    key, kx2 = jax.random.split(key)
    x2 = jax.random.normal(kx2, (100, num_features), jnp.float32)
    out2 = jax.block_until_ready(cv_mlp_forward(x2, weights, biases, batch_tile=32))
    ref2 = _reference_forward(x2, weights, biases)
    assert out2.shape == (100, num_targets)
    assert jnp.allclose(out2, ref2, atol=1e-5, rtol=1e-5), "mismatch (tiled) vs reference"

    print("KERNEL_OK")
</pallas_src>

<mosaic_0001>
module attributes {stable_mosaic.version = 11 : i64} {
  func.func @kernel(%arg0: i32, %arg1: memref<16x128xf32, #tpu.memory_space<vmem>>, %arg2: memref<3x128x128xf32, #tpu.memory_space<vmem>>, %arg3: memref<3x128xf32, #tpu.memory_space<vmem>>, %arg4: memref<16x128xf32, #tpu.memory_space<vmem>>) attributes {dimension_semantics = [#tpu.dimension_semantics<parallel>], iteration_bounds = array<i64: 1>, scalar_prefetch = 0 : i64, scratch_operands = 0 : i64, tpu.core_type = #tpu.core_type<tc>, window_params = [{transform_indices = @transform_0, window_bounds = array<i64: 16, 128>}, {pipeline_mode = #tpu.pipeline_mode<synchronous>, transform_indices = @transform_1, window_bounds = array<i64: 3, 128, 128>}, {pipeline_mode = #tpu.pipeline_mode<synchronous>, transform_indices = @transform_2, window_bounds = array<i64: 3, 128>}, {transform_indices = @transform_3, window_bounds = array<i64: 16, 128>}]} {
    %c0 = arith.constant 0 : index
    %c0_0 = arith.constant 0 : index
    %0 = vector.load %arg1[%c0, %c0_0] : memref<16x128xf32, #tpu.memory_space<vmem>>, vector<16x128xf32>
    %c0_1 = arith.constant 0 : index
    %c0_2 = arith.constant 0 : index
    %c0_3 = arith.constant 0 : index
    %1 = vector.load %arg2[%c0_1, %c0_2, %c0_3] : memref<3x128x128xf32, #tpu.memory_space<vmem>>, vector<1x128x128xf32>
    %2 = vector.shape_cast %1 : vector<1x128x128xf32> to vector<128x128xf32>
    %c0_4 = arith.constant 0 : index
    %c0_5 = arith.constant 0 : index
    %3 = vector.load %arg3[%c0_4, %c0_5] : memref<3x128xf32, #tpu.memory_space<vmem>>, vector<1x128xf32>
    %cst = arith.constant dense<0.000000e+00> : vector<16x128xf32>
    %4 = tpu.matmul %0, %2, %cst {dimension_numbers = #tpu.dot_dimension_numbers<[1], [0], [0], [1], [0, 0, 1, 1], [], []>} : vector<16x128xf32>, vector<128x128xf32>, vector<16x128xf32> -> vector<16x128xf32>
    %5 = vector.broadcast %3 : vector<1x128xf32> to vector<16x128xf32>
    %6 = arith.addf %4, %5 : vector<16x128xf32>
    %cst_6 = arith.constant 0.000000e+00 : f32
    %7 = vector.broadcast %cst_6 : f32 to vector<16x128xf32>
    %8 = arith.maximumf %6, %7 : vector<16x128xf32>
    %c1 = arith.constant 1 : index
    %c0_7 = arith.constant 0 : index
    %c0_8 = arith.constant 0 : index
    %9 = vector.load %arg2[%c1, %c0_7, %c0_8] : memref<3x128x128xf32, #tpu.memory_space<vmem>>, vector<1x128x128xf32>
    %10 = vector.shape_cast %9 : vector<1x128x128xf32> to vector<128x128xf32>
    %c1_9 = arith.constant 1 : index
    %c0_10 = arith.constant 0 : index
    %11 = vector.load %arg3[%c1_9, %c0_10] : memref<3x128xf32, #tpu.memory_space<vmem>>, vector<1x128xf32>
    %cst_11 = arith.constant dense<0.000000e+00> : vector<16x128xf32>
    %12 = tpu.matmul %8, %10, %cst_11 {dimension_numbers = #tpu.dot_dimension_numbers<[1], [0], [0], [1], [0, 0, 1, 1], [], []>} : vector<16x128xf32>, vector<128x128xf32>, vector<16x128xf32> -> vector<16x128xf32>
    %13 = vector.broadcast %11 : vector<1x128xf32> to vector<16x128xf32>
    %14 = arith.addf %12, %13 : vector<16x128xf32>
    %cst_12 = arith.constant 0.000000e+00 : f32
    %15 = vector.broadcast %cst_12 : f32 to vector<16x128xf32>
    %16 = arith.maximumf %14, %15 : vector<16x128xf32>
    %c2 = arith.constant 2 : index
    %c0_13 = arith.constant 0 : index
    %c0_14 = arith.constant 0 : index
    %17 = vector.load %arg2[%c2, %c0_13, %c0_14] : memref<3x128x128xf32, #tpu.memory_space<vmem>>, vector<1x128x128xf32>
    %18 = vector.shape_cast %17 : vector<1x128x128xf32> to vector<128x128xf32>
    %c2_15 = arith.constant 2 : index
    %c0_16 = arith.constant 0 : index
    %19 = vector.load %arg3[%c2_15, %c0_16] : memref<3x128xf32, #tpu.memory_space<vmem>>, vector<1x128xf32>
    %cst_17 = arith.constant dense<0.000000e+00> : vector<16x128xf32>
    %20 = tpu.matmul %16, %18, %cst_17 {dimension_numbers = #tpu.dot_dimension_numbers<[1], [0], [0], [1], [0, 0, 1, 1], [], []>} : vector<16x128xf32>, vector<128x128xf32>, vector<16x128xf32> -> vector<16x128xf32>
    %21 = vector.broadcast %19 : vector<1x128xf32> to vector<16x128xf32>
    %22 = arith.addf %20, %21 : vector<16x128xf32>
    %23 = arith.negf %22 : vector<16x128xf32>
    %24 = math.exp %23 : vector<16x128xf32>
    %cst_18 = arith.constant 1.000000e+00 : f32
    %25 = vector.broadcast %cst_18 : f32 to vector<16x128xf32>
    %26 = arith.addf %25, %24 : vector<16x128xf32>
    %27 = arith.divf %25, %26 : vector<16x128xf32>
    %c0_19 = arith.constant 0 : index
    %c0_20 = arith.constant 0 : index
    %28 = vector.load %arg4[%c0_19, %c0_20] : memref<16x128xf32, #tpu.memory_space<vmem>>, vector<16x128xf32>
    tpu.vector_store %arg4[%c0_19, %c0_20], %27 {strides = array<i32>} : memref<16x128xf32, #tpu.memory_space<vmem>>, vector<16x128xf32>,
    return
  }
  func.func @transform_0(%arg0: i32) -> (i32, i32) {
    %c0_i32 = arith.constant 0 : i32
    %c0_i32_0 = arith.constant 0 : i32
    return %arg0, %c0_i32 : i32, i32
  }
  func.func @transform_1(%arg0: i32) -> (i32, i32, i32) {
    %c0_i32 = arith.constant 0 : i32
    %c0_i32_0 = arith.constant 0 : i32
    %c0_i32_1 = arith.constant 0 : i32
    %c0_i32_2 = arith.constant 0 : i32
    return %c0_i32, %c0_i32_0, %c0_i32_1 : i32, i32, i32
  }
  func.func @transform_2(%arg0: i32) -> (i32, i32) {
    %c0_i32 = arith.constant 0 : i32
    %c0_i32_0 = arith.constant 0 : i32
    %c0_i32_1 = arith.constant 0 : i32
    return %c0_i32, %c0_i32_0 : i32, i32
  }
  func.func @transform_3(%arg0: i32) -> (i32, i32) {
    %c0_i32 = arith.constant 0 : i32
    %c0_i32_0 = arith.constant 0 : i32
    return %arg0, %c0_i32 : i32, i32
  }
}

</mosaic_0001>

<bundles_post_ra>
// kernel: tpu_custom_call.1
= control target key start
LH: loop header
LB: loop body
LE: loop exit
PB: predicated region body
PF: predicated region fallthrough
CT: control target
= control target key end

     0   :  { %8 = vsyncpa [#allocation3], 0  ;;  %s693_s0 = inlined_call_operand.hbm [shape: f32[16,128], index: 0, kind: input, shape index: {}]   ;;  %s694_s1 = inlined_call_operand.hbm [shape: f32[3,128,128], index: 1, kind: input, shape index: {}]   ;;  %s695_s2 = inlined_call_operand.hbm [shape: f32[3,128], index: 2, kind: input, shape index: {}]   ;;  %s696_s3 = inlined_call_operand.hbm [shape: f32[16,128], index: 3, kind: output, shape index: {}]  }
   0x1   :  { %9 = vsyncpa [#allocation6], 0 }
   0x2   :  { %10 = vsyncpa [#allocation4], 0  ;;  %s646_s12 = smov [#allocation5]   ;;  %s647_s14 = smov [#allocation2]  }
   0x3   :  { %s28_s13 = sshll.u32 %s646_s12, 4  ;;  %s16_s15 = sshll.u32 %s647_s14, 4  ;;  %s29_s13 = int_to_ptr.vmem [resolvable:$true] %s28_s13  ;;  %s17_s15 = int_to_ptr.vmem [resolvable:$true] %s16_s15 }
   0x4   :  { %s568_s16 = scalar_lea.vmem %s29_s13, 6144  ;;  %p573_p1 = scmp.lt.s32.totalorder %s29_s13, %s29_s13 }
   0x5   :  { %p569_p0 = scmp.ne.s32.totalorder %s29_s13, %s568_s16  ;;  %p574_p2 = scmp.lt.s32.totalorder %s568_s16, %s568_s16 }
   0x7   :  { %p575_p3 = por %p574_p2, %p573_p1 }
   0x9   :  { %p576_p4 = pnand %p575_p3, %p569_p0 }
   0xb   :  { %579 = shalt.err (!%p576_p4)
}
   0xc   :  { %s648_s17 = smov 128   ;;  %s649_s18 = smov 8  }
   0xd   :  { %34 = dma.hbm_to_vmem [thread:$0]  %s694_s1, 6144, %s29_s13, [#allocation6], %s648_s17, %s648_s17, %s649_s18  }
   0xe   :  { %s588_s21 = scalar_lea.vmem %s17_s15, 256  ;;  %p593_p6 = scmp.lt.s32.totalorder %s17_s15, %s17_s15 }
   0xf   :  { %p589_p5 = scmp.ne.s32.totalorder %s17_s15, %s588_s21  ;;  %p594_p7 = scmp.lt.s32.totalorder %s588_s21, %s588_s21 }
  0x11   :  { %p595_p8 = por %p594_p7, %p593_p6 }
  0x13   :  { %p596_p9 = pnand %p595_p8, %p589_p5 }
  0x15   :  { %599 = shalt.err (!%p596_p9)
}
  0x16   :  { %22 = dma.hbm_to_vmem [thread:$0]  %s693_s0, 256, %s17_s15, [#allocation3], %s648_s17, %s648_s17, %s649_s18  }
  0x17   :  { %s650_s24 = smov [#allocation7]  }
  0x18   :  { %s41_s25 = sshll.u32 %s650_s24, 4  ;;  %s42_s25 = int_to_ptr.vmem [resolvable:$true] %s41_s25 }
  0x19   :  { %s608_s26 = scalar_lea.vmem %s42_s25, 64  ;;  %p613_p11 = scmp.lt.s32.totalorder %s42_s25, %s42_s25 }
  0x1a   :  { %p609_p10 = scmp.ne.s32.totalorder %s42_s25, %s608_s26  ;;  %p614_p12 = scmp.lt.s32.totalorder %s608_s26, %s608_s26 }
  0x1c   :  { %p615_p13 = por %p614_p12, %p613_p11 }
  0x1e   :  { %p616_p0 = pnand %p615_p13, %p609_p10 }
  0x20   :  { %619 = shalt.err (!%p616_p0)
}
  0x21   :  { %44 = dma.hbm_to_vmem [thread:$0]  %s695_s2, 64, %s42_s25, [#allocation6]  }
  0x22   :  { %640 = dma.done.wait [#allocation3], 256  }
  0x23   :  { %641 = vsyncadd [#allocation3], 4294967040 }
  0x24   :  { %642 = dma.done.wait [#allocation6], 6208  }
  0x25   :  { %643 = vsyncadd [#allocation6], 4294961088  ;;  %v71_v0 = vld [vmem:[#allocation5 + $0x78] sm:$0xff]  ;;  %v70_v1 = vld [vmem:[#allocation5 + $0x70] sm:$0xff]  ;;  %s651_s0 = smov [#allocation8]  }
  0x26   :  { %441 = vmatprep.subr.mxu0 %v71_v0  ;;  %v69_v2 = vld [vmem:[#allocation5 + $0x68] sm:$0xff]  ;;  %v68_v3 = vld [vmem:[#allocation5 + $0x60] sm:$0xff]  ;;  %v54_v4 = vld [vmem:[#allocation2] sm:$0xff]  ;;  %s369_s2 = sshll.u32 %s651_s0, 4  ;;  %s370_s2 = int_to_ptr.vmem [resolvable:$true] %s369_s2 }
  0x27   :  { %442 = vmatpush3.msra.mxu0 %v71_v0  ;;  %v67_v5 = vld [vmem:[#allocation5 + $0x58] sm:$0xff]  ;;  %473 = vmatprep.mubr.f32.mxu0 %v54_v4  ;;  %v169_v7 = vld [vmem:[#allocation5 + $0xf0] sm:$0xff]  ;;  %v168_v9 = vld [vmem:[#allocation5 + $0xe8] sm:$0xff]  ;;  %s620_s28 = scalar_lea.vmem %s370_s2, 256  ;;  %p625_p2 = scmp.lt.s32.totalorder %s370_s2, %s370_s2 }
  0x28   :  { %443 = vmatprep.subr.mxu0 %v70_v1  ;;  %v170_v6 = vld [vmem:[#allocation5 + $0xf8] sm:$0xff]  ;;  %v66_v8 = vld [vmem:[#allocation5 + $0x50] sm:$0xff]  ;;  %v65_v10 = vld [vmem:[#allocation5 + $0x48] sm:$0xff]  ;;  %p621_p1 = scmp.ne.s32.totalorder %s370_s2, %s620_s28  ;;  %p626_p3 = scmp.lt.s32.totalorder %s620_s28, %s620_s28 }
  0x29   :  { %444 = vmatpush3.msra.mxu0 %v70_v1  ;;  %476 = vmatprep.subr.mxu1 %v170_v6  ;;  %v167_v11 = vld [vmem:[#allocation5 + $0xe0] sm:$0xff]  ;;  %v166_v13 = vld [vmem:[#allocation5 + $0xd8] sm:$0xff]  ;;  %v165_v15 = vld [vmem:[#allocation5 + $0xd0] sm:$0xff] }
  0x2a   :  { %445 = vmatprep.subr.mxu0 %v69_v2  ;;  %477 = vmatpush3.msra.mxu1 %v170_v6  ;;  %v64_v12 = vld [vmem:[#allocation5 + $0x40] sm:$0xff]  ;;  %v63_v14 = vld [vmem:[#allocation5 + $0x38] sm:$0xff]  ;;  %v62_v16 = vld [vmem:[#allocation5 + $0x30] sm:$0xff]  ;;  %p627_p4 = por %p626_p3, %p625_p2 }
  0x2b   :  { %446 = vmatpush3.msra.mxu0 %v69_v2  ;;  %478 = vmatprep.subr.mxu1 %v169_v7  ;;  %v164_v17 = vld [vmem:[#allocation5 + $0xc8] sm:$0xff]  ;;  %v163_v19 = vld [vmem:[#allocation5 + $0xc0] sm:$0xff]  ;;  %v162_v21 = vld [vmem:[#allocation5 + $0xb8] sm:$0xff] }
  0x2c   :  { %447 = vmatprep.subr.mxu0 %v68_v3  ;;  %479 = vmatpush3.msra.mxu1 %v169_v7  ;;  %v61_v18 = vld [vmem:[#allocation5 + $0x28] sm:$0xff]  ;;  %v60_v20 = vld [vmem:[#allocation5 + $0x20] sm:$0xff]  ;;  %v59_v22 = vld [vmem:[#allocation5 + $0x18] sm:$0xff]  ;;  %p628_p5 = pnand %p627_p4, %p621_p1 }
  0x2d   :  { %448 = vmatpush3.msra.mxu0 %v68_v3  ;;  %480 = vmatprep.subr.mxu1 %v168_v9  ;;  %v161_v23 = vld [vmem:[#allocation5 + $0xb0] sm:$0xff]  ;;  %v160_v25 = vld [vmem:[#allocation5 + $0xa8] sm:$0xff]  ;;  %v159_v27 = vld [vmem:[#allocation5 + $0xa0] sm:$0xff] }
  0x2e   :  { %449 = vmatprep.subr.mxu0 %v67_v5  ;;  %481 = vmatpush3.msra.mxu1 %v168_v9  ;;  %v58_v24 = vld [vmem:[#allocation5 + $0x10] sm:$0xff]  ;;  %v57_v26 = vld [vmem:[#allocation5 + $0x8] sm:$0xff]  ;;  %v56_v28 = vld [vmem:[#allocation5] sm:$0xff] }
  0x2f   :  { %450 = vmatpush3.msra.mxu0 %v67_v5  ;;  %482 = vmatprep.subr.mxu1 %v167_v11  ;;  %v55_v29 = vld [vmem:[#allocation2 + $0x8] sm:$0xff]  ;;  %v157_v31 = vld [vmem:[#allocation5 + $0x90] sm:$0xff]  ;;  %v156_v32 = vld [vmem:[#allocation5 + $0x88] sm:$0xff] }
  0x30   :  { %451 = vmatprep.subr.mxu0 %v66_v8  ;;  %483 = vmatpush3.msra.mxu1 %v167_v11  ;;  %v158_v30 = vld [vmem:[#allocation5 + $0x98] sm:$0xff]  ;;  %v155_v33 = vld [vmem:[#allocation5 + $0x80] sm:$0xff]  ;;  %v268_v35 = vld [vmem:[#allocation5 + $0x170] sm:$0xff] }
  0x31   :  { %452 = vmatpush3.msra.mxu0 %v66_v8  ;;  %484 = vmatprep.subr.mxu1 %v166_v13  ;;  %v269_v34 = vld [vmem:[#allocation5 + $0x178] sm:$0xff]  ;;  %v267_v36 = vld [vmem:[#allocation5 + $0x168] sm:$0xff]  ;;  %v266_v37 = vld [vmem:[#allocation5 + $0x160] sm:$0xff] }
  0x32   :  { %453 = vmatprep.subr.mxu0 %v65_v10  ;;  %485 = vmatpush3.msra.mxu1 %v166_v13  ;;  %v265_v38 = vld [vmem:[#allocation5 + $0x158] sm:$0xff]  ;;  %v264_v39 = vld [vmem:[#allocation5 + $0x150] sm:$0xff]  ;;  %v263_v40 = vld [vmem:[#allocation5 + $0x148] sm:$0xff] }
  0x33   :  { %454 = vmatpush3.msra.mxu0 %v65_v10  ;;  %486 = vmatprep.subr.mxu1 %v165_v15  ;;  %v262_v41 = vld [vmem:[#allocation5 + $0x140] sm:$0xff]  ;;  %v261_v42 = vld [vmem:[#allocation5 + $0x138] sm:$0xff]  ;;  %v260_v43 = vld [vmem:[#allocation5 + $0x130] sm:$0xff] }
  0x34   :  { %455 = vmatprep.subr.mxu0 %v64_v12  ;;  %487 = vmatpush3.msra.mxu1 %v165_v15  ;;  %v259_v44 = vld [vmem:[#allocation5 + $0x128] sm:$0xff]  ;;  %v258_v45 = vld [vmem:[#allocation5 + $0x120] sm:$0xff]  ;;  %v257_v53 = vld [vmem:[#allocation5 + $0x118] sm:$0xff] }
  0x35   :  { %456 = vmatpush3.msra.mxu0 %v64_v12  ;;  %488 = vmatprep.subr.mxu1 %v164_v17  ;;  %v382_v46 = vld [vmem:[#allocation7] ss:$0 sm:$0xff]  ;;  %v256_v54 = vld [vmem:[#allocation5 + $0x110] sm:$0xff]  ;;  %v255_v55 = vld [vmem:[#allocation5 + $0x108] sm:$0xff] }
  0x36   :  { %457 = vmatprep.subr.mxu0 %v63_v14  ;;  %489 = vmatpush3.msra.mxu1 %v164_v17  ;;  %v254_v56 = vld [vmem:[#allocation5 + $0x100] sm:$0xff] }
  0x37   :  { %458 = vmatpush3.msra.mxu0 %v63_v14  ;;  %490 = vmatprep.subr.mxu1 %v163_v19  ;;  %v383_v57 = vld [vmem:[#allocation7 + $0x1] ss:$0 sm:$0xff]  ;;  %v384_v0 = vld [vmem:[#allocation7 + $0x2] ss:$0 sm:$0xff] }
  0x38   :  { %459 = vmatprep.subr.mxu0 %v62_v16  ;;  %491 = vmatpush3.msra.mxu1 %v163_v19 }
  0x39   :  { %460 = vmatpush3.msra.mxu0 %v62_v16  ;;  %492 = vmatprep.subr.mxu1 %v162_v21 }
  0x3a   :  { %461 = vmatprep.subr.mxu0 %v61_v18  ;;  %493 = vmatpush3.msra.mxu1 %v162_v21 }
  0x3b   :  { %462 = vmatpush3.msra.mxu0 %v61_v18  ;;  %494 = vmatprep.subr.mxu1 %v161_v23 }
  0x3c   :  { %463 = vmatprep.subr.mxu0 %v60_v20  ;;  %495 = vmatpush3.msra.mxu1 %v161_v23 }
  0x3d   :  { %464 = vmatpush3.msra.mxu0 %v60_v20  ;;  %496 = vmatprep.subr.mxu1 %v160_v25 }
  0x3e   :  { %465 = vmatprep.subr.mxu0 %v59_v22  ;;  %497 = vmatpush3.msra.mxu1 %v160_v25 }
  0x3f   :  { %466 = vmatpush3.msra.mxu0 %v59_v22  ;;  %498 = vmatprep.subr.mxu1 %v159_v27 }
  0x40   :  { %467 = vmatprep.subr.mxu0 %v58_v24  ;;  %499 = vmatpush3.msra.mxu1 %v159_v27 }
  0x41   :  { %468 = vmatpush3.msra.mxu0 %v58_v24  ;;  %500 = vmatprep.subr.mxu1 %v158_v30 }
  0x42   :  { %469 = vmatprep.subr.mxu0 %v57_v26  ;;  %501 = vmatpush3.msra.mxu1 %v158_v30 }
  0x43   :  { %470 = vmatpush3.msra.mxu0 %v57_v26  ;;  %502 = vmatprep.subr.mxu1 %v157_v31 }
  0x44   :  { %471 = vmatprep.subr.mxu0 %v56_v28  ;;  %503 = vmatpush3.msra.mxu1 %v157_v31 }
  0x45   :  { %472 = vmatpush3.msra.mxu0 %v56_v28  ;;  %504 = vmatprep.subr.mxu1 %v156_v32 }
  0x46   :  { %474 = vmatmul.mubr.f32.vlgmr.msra.gmra.mxu0 %v55_v29  ;;  %505 = vmatpush3.msra.mxu1 %v156_v32 }
  0x47   :  { %506 = vmatprep.subr.mxu1 %v155_v33  ;;  %511 = vmatprep.subr.mxu0 %v269_v34 }
  0x48   :  { %507 = vmatpush3.msra.mxu1 %v155_v33  ;;  %512 = vmatpush3.msra.mxu0 %v269_v34 }
  0x49   :  { %513 = vmatprep.subr.mxu0 %v268_v35 }
  0x4a   :  { %514 = vmatpush3.msra.mxu0 %v268_v35 }
  0x4b   :  { %515 = vmatprep.subr.mxu0 %v267_v36 }
  0x4c   :  { %516 = vmatpush3.msra.mxu0 %v267_v36 }
  0x4d   :  { %517 = vmatprep.subr.mxu0 %v266_v37 }
  0x4e   :  { %518 = vmatpush3.msra.mxu0 %v266_v37 }
  0x4f   :  { %519 = vmatprep.subr.mxu0 %v265_v38 }
  0x50   :  { %520 = vmatpush3.msra.mxu0 %v265_v38 }
  0x51   :  { %521 = vmatprep.subr.mxu0 %v264_v39 }
  0x52   :  { %522 = vmatpush3.msra.mxu0 %v264_v39 }
  0x53   :  { %523 = vmatprep.subr.mxu0 %v263_v40 }
  0x54   :  { %524 = vmatpush3.msra.mxu0 %v263_v40 }
  0x55   :  { %525 = vmatprep.subr.mxu0 %v262_v41 }
  0x56   :  { %526 = vmatpush3.msra.mxu0 %v262_v41 }
  0x57   :  { %527 = vmatprep.subr.mxu0 %v261_v42 }
  0x58   :  { %528 = vmatpush3.msra.mxu0 %v261_v42 }
  0x59   :  { %529 = vmatprep.subr.mxu0 %v260_v43 }
  0x5a   :  { %530 = vmatpush3.msra.mxu0 %v260_v43 }
  0x5b   :  { %531 = vmatprep.subr.mxu0 %v259_v44 }
  0x5c   :  { %532 = vmatpush3.msra.mxu0 %v259_v44 }
  0x5d   :  { %533 = vmatprep.subr.mxu0 %v258_v45 }
  0x5e   :  { %534 = vmatpush3.msra.mxu0 %v258_v45 }
  0x5f   :  { %535 = vmatprep.subr.mxu0 %v257_v53 }
  0x60   :  { %536 = vmatpush3.msra.mxu0 %v257_v53 }
  0x61   :  { %537 = vmatprep.subr.mxu0 %v256_v54 }
  0x62   :  { %538 = vmatpush3.msra.mxu0 %v256_v54 }
  0x63   :  { %539 = vmatprep.subr.mxu0 %v255_v55 }
  0x64   :  { %540 = vmatpush3.msra.mxu0 %v255_v55 }
  0x65   :  { %541 = vmatprep.subr.mxu0 %v254_v56 }
  0x66   :  { %542 = vmatpush3.msra.mxu0 %v254_v56 }
 0x106   :  { %v475_v47 = vpop.f32.mrf.mxu0 }
 0x107   :  { %v149_v48 = vadd.f32 %v475_v47, %v382_v46 }
 0x108   :  { %v143_v49 = vpop.f32.mrf.mxu0 }
 0x109   :  { %v144_v50 = vadd.f32 %v382_v46, %v143_v49  ;;  %v153_v52 = vmax.f32 %v149_v48, 0.0 }
 0x10b   :  { %v152_v51 = vmax.f32 %v144_v50, 0.0 }
 0x10d   :  { %508 = vmatprep.mubr.f32.mxu1 %v152_v51 }
 0x10e   :  { %509 = vmatmul.mubr.f32.vlgmr.msra.gmra.mxu1 %v153_v52 }
 0x1ce   :  { %v510_v58 = vpop.f32.mrf.mxu1 }
 0x1cf   :  { %v248_v59 = vadd.f32 %v510_v58, %v383_v57 }
 0x1d0   :  { %v242_v60 = vpop.f32.mrf.mxu1 }
 0x1d1   :  { %v243_v61 = vadd.f32 %v383_v57, %v242_v60  ;;  %v252_v63 = vmax.f32 %v248_v59, 0.0 }
 0x1d3   :  { %v251_v62 = vmax.f32 %v243_v61, 0.0 }
 0x1d5   :  { %543 = vmatprep.mubr.f32.mxu0 %v251_v62 }
 0x1d6   :  { %544 = vmatmul.mubr.f32.vlgmr.msra.gmra.mxu0 %v252_v63 }
 0x296   :  { %v545_v1 = vpop.f32.mrf.mxu0 }
 0x297   :  { %v347_v2 = vadd.f32 %v545_v1, %v384_v0 }
 0x298   :  { %v341_v3 = vpop.f32.mrf.mxu0 }
 0x299   :  { %v386_v4 = vmul.f32 -1.442695, %v347_v2  ;;  %v342_v5 = vadd.f32 %v384_v0, %v341_v3 }
 0x29b   :  { %552 = vpow2.f32 %v386_v4  ;;  %v385_v6 = vmul.f32 -1.442695, %v342_v5 }
 0x29d   :  { %554 = vpow2.f32 %v385_v6 }
 0x2a8   :  { %v553_v7 = vpop.eup %552 }
 0x2a9   :  { %v357_v8 = vadd.f32 1.0, %v553_v7 }
 0x2aa   :  { %v555_v9 = vpop.eup %554 }
 0x2ab   :  { %556 = vrcp.f32 %v357_v8  ;;  %v356_v10 = vadd.f32 1.0, %v555_v9 }
 0x2ad   :  { %558 = vrcp.f32 %v356_v10 }
 0x2b8   :  { %v557_v11 = vpop.eup %556 }
 0x2b9   :  { %363 = vst [vmem:[#allocation8 + $0x8] sm:$0xff] %v557_v11 }
 0x2ba   :  { %v559_v12 = vpop.eup %558 }
 0x2bb   :  { %362 = vst [vmem:[#allocation8] sm:$0xff] %v559_v12 }
 0x2bc   :  { %631 = shalt.err (!%p628_p5)
}
 0x2bd   :  { %375 = dma.vmem_to_hbm [thread:$0]  %s370_s2, 256, %s696_s3, [#allocation4], %s648_s17, %s648_s17, %s649_s18  }
 0x2be   :  { %644 = dma.done.wait [#allocation4], 256  }
 0x2bf   :  { %645 = vsyncadd [#allocation4], 4294967040 }
 0x2c0   :  { %379 = vsyncpa [#allocation3], 1 }
 0x2c1   :  { %380 = vsyncpa [#allocation6], 1 }
 0x2c2   :  { %381 = vsyncpa [#allocation4], 1 }

</bundles_post_ra>
